<compile_context>
chip_gen: v7x
topology: tpu7x:2x2x1
jax: 0.10.0
libtpu: 0.0.40
codegen_flags: <defaults>
</compile_context>

<pallas_src>
import numpy as np
import jax
import jax.numpy as jnp
from jax.experimental import pallas as pl
from jax.experimental.pallas import tpu as pltpu


_VMEM_BUDGET = 40 * 1024 * 1024   # per-call working-set target (fits v7x's 64 MiB)
_VMEM_LIMIT = 48 * 1024 * 1024    # scoped VMEM limit handed to Mosaic


def _round_up(v, m):
    return ((v + m - 1) // m) * m


def _matmul_crossover(dtype):
    # Rough roofline crossover where the one-hot matmul stops being
    # bandwidth-competitive with a lane gather: ~256 channels for 32-bit
    # activations, ~1024 for 16-bit.  Above this use the XLA gather fallback.
    return 256 if jnp.dtype(dtype).itemsize >= 4 else 1024


def _permute_matmul_kernel(x_ref, p_ref, o_ref):
    # y = x @ P with P a one-hot permutation matrix -> exact channel gather on
    # the MXU; avoids lane-axis XLU shuffles and keeps everything in one kernel.
    o_ref[...] = jnp.dot(
        x_ref[...], p_ref[...], preferred_element_type=jnp.float32
    ).astype(o_ref.dtype)


def _batch_tile(b, c, itemsize, p_bytes):
    """Batch tile: VMEM-budgeted, sublane-aligned, aiming for >= ~8 grid steps."""
    sub = max(8, 32 // itemsize)          # sublane quantum: 8 f32 / 16 bf16
    if b <= sub:
        return b                          # full-array block is always legal
    # Double-buffered x tile + double-buffered out tile; P counted separately
    # (single-buffered, constant block index).
    row_bytes = 4 * c * itemsize
    tb_max = max(sub, ((_VMEM_BUDGET - p_bytes) // row_bytes) // sub * sub)
    # >= ~8 grid steps lets the "parallel" batch axis shard across both
    # TensorCores (v7x) and gives the DMA pipeline something to overlap.
    tb_target = _round_up(pl.cdiv(b, 8), sub)
    return max(sub, min(tb_max, tb_target, _round_up(b, sub)))


def _permute_pallas(x, p_mat):
    b, c = x.shape
    itemsize = x.dtype.itemsize
    p_bytes = c * c * p_mat.dtype.itemsize          # single-buffered P
    tb = _batch_tile(b, c, itemsize, p_bytes)
    grid = (pl.cdiv(b, tb),)

    cost = pl.CostEstimate(
        flops=2 * b * c * c,
        transcendentals=0,
        bytes_accessed=2 * b * c * itemsize + p_bytes,
    )

    return pl.pallas_call(
        _permute_matmul_kernel,
        out_shape=jax.ShapeDtypeStruct((b, c), x.dtype),
        grid=grid,
        in_specs=[
            pl.BlockSpec((tb, c), lambda i: (i, 0)),
            # Constant block index + single buffer: P is DMA'd once and stays
            # VMEM-resident across all batch tiles without a second copy.
            pl.BlockSpec((c, c), lambda i: (0, 0), pipeline_mode=pl.Buffered(1)),
        ],
        out_specs=pl.BlockSpec((tb, c), lambda i: (i, 0)),
        compiler_params=pltpu.CompilerParams(
            dimension_semantics=("parallel",),
            vmem_limit_bytes=_VMEM_LIMIT,
        ),
        cost_estimate=cost,
    )(x, p_mat)


class PermuteLayer:
    """Pallas port of permute_layer: permutes the channel axis in a random but
    fixed way (seeded exactly like the torch module, via numpy)."""

    def __init__(self, dims_in, seed):
        self.in_channels = dims_in[0][0]
        np.random.seed(seed)
        self.perm = np.random.permutation(self.in_channels)
        np.random.seed()
        self.perm_inv = np.zeros_like(self.perm)
        for i, p in enumerate(self.perm):
            self.perm_inv[p] = i
        # One-hot permutation matrices, built lazily per activation dtype so a
        # bf16 input multiplies a bf16 P (single-pass MXU, half the VMEM)
        # instead of being promoted to the multi-pass f32 path.
        self._p_cache = {}

    def _onehot(self, rev, dtype):
        key = (bool(rev), jnp.dtype(dtype).name)
        if key not in self._p_cache:
            perm = self.perm_inv if rev else self.perm
            c = self.in_channels
            p = np.zeros((c, c), np.float32)
            p[perm, np.arange(c)] = 1.0      # (x @ p)[:, j] == x[:, perm[j]]
            self._p_cache[key] = jnp.asarray(p).astype(dtype)
        return self._p_cache[key]

    def _run(self, x, rev):
        perm = self.perm_inv if rev else self.perm
        if (x.ndim != 2
                or not jnp.issubdtype(x.dtype, jnp.floating)
                or x.shape[1] > _matmul_crossover(x.dtype)):
            # Large C: the O(B*C^2) matmul is MXU-bound while the op only moves
            # O(B*C) bytes -> a plain lane gather (HBM-bound) is the right tool.
            # Also the exact path for integer dtypes and >2-D inputs.
            return x[:, jnp.asarray(perm)]
        assert x.shape[1] == self.in_channels
        return _permute_pallas(x, self._onehot(rev, x.dtype))

    def forward(self, x, rev=False):
        # Matches torch: x is a list holding a single (B, C) tensor.
        return [self._run(x[0], rev)]

    def jacobian(self, x, rev=False):
        return 0.0

    def output_dims(self, input_dims):
        assert len(input_dims) == 1, "Can only use 1 input"
        return input_dims


if __name__ == "__main__":
    C = 16
    layer = PermuteLayer(dims_in=[(C,)], seed=0)
    perm = jnp.asarray(layer.perm)

    key = jax.random.PRNGKey(0)
    k0, k1, k2 = jax.random.split(key, 3)

    # --- f32, B=8: forward + exact inverse round-trip -----------------------
    x = jax.random.normal(k0, (8, C), jnp.float32)
    y = jax.block_until_ready(layer.forward([x])[0])
    assert y.shape == x.shape and y.dtype == x.dtype
    assert jnp.array_equal(y, x[:, perm]), "forward permutation mismatch"
    x_back = jax.block_until_ready(layer.forward([y], rev=True)[0])
    assert jnp.array_equal(x_back, x), "inverse permutation mismatch"

    # --- f32, B=12: batch not a multiple of the 8-row tile -> partial block --
    x2 = jax.random.normal(k1, (12, C), jnp.float32)
    y2 = jax.block_until_ready(layer.forward([x2])[0])
    assert jnp.array_equal(y2, x2[:, perm]), "partial-tile forward mismatch"

    # --- bf16, B=16: P built in bf16; gather-via-one-hot is still bit exact --
    xb = jax.random.normal(k2, (16, C), jnp.float32).astype(jnp.bfloat16)
    yb = jax.block_until_ready(layer.forward([xb])[0])
    assert yb.dtype == jnp.bfloat16
    assert jnp.array_equal(yb, xb[:, perm]), "bf16 forward mismatch"

    print("KERNEL_OK")
</pallas_src>

<mosaic_0001>
module attributes {stable_mosaic.version = 11 : i64} {
  func.func @_permute_matmul_kernel(%arg0: i32, %arg1: memref<8x16xf32, #tpu.memory_space<vmem>>, %arg2: memref<16x16xf32, #tpu.memory_space<vmem>>, %arg3: memref<8x16xf32, #tpu.memory_space<vmem>>) attributes {dimension_semantics = [#tpu.dimension_semantics<parallel>], iteration_bounds = array<i64: 1>, scalar_prefetch = 0 : i64, scratch_operands = 0 : i64, tpu.core_type = #tpu.core_type<tc>, window_params = [{transform_indices = @transform_0, window_bounds = array<i64: 8, 16>}, {pipeline_mode = #tpu.pipeline_mode<synchronous>, transform_indices = @transform_1, window_bounds = array<i64: 16, 16>}, {transform_indices = @transform_2, window_bounds = array<i64: 8, 16>}]} {
    %c0 = arith.constant 0 : index
    %c0_0 = arith.constant 0 : index
    %0 = vector.load %arg1[%c0, %c0_0] : memref<8x16xf32, #tpu.memory_space<vmem>>, vector<8x16xf32>
    %c0_1 = arith.constant 0 : index
    %c0_2 = arith.constant 0 : index
    %1 = vector.load %arg2[%c0_1, %c0_2] : memref<16x16xf32, #tpu.memory_space<vmem>>, vector<16x16xf32>
    %cst = arith.constant dense<0.000000e+00> : vector<8x16xf32>
    %2 = tpu.matmul %0, %1, %cst {dimension_numbers = #tpu.dot_dimension_numbers<[1], [0], [0], [1], [0, 0, 1, 1], [], []>} : vector<8x16xf32>, vector<16x16xf32>, vector<8x16xf32> -> vector<8x16xf32>
    %c0_3 = arith.constant 0 : index
    %c0_4 = arith.constant 0 : index
    %3 = vector.load %arg3[%c0_3, %c0_4] : memref<8x16xf32, #tpu.memory_space<vmem>>, vector<8x16xf32>
    tpu.vector_store %arg3[%c0_3, %c0_4], %2 {strides = array<i32>} : memref<8x16xf32, #tpu.memory_space<vmem>>, vector<8x16xf32>,
    return
  }
  func.func @transform_0(%arg0: i32) -> (i32, i32) {
    %c0_i32 = arith.constant 0 : i32
    %c0_i32_0 = arith.constant 0 : i32
    return %arg0, %c0_i32 : i32, i32
  }
  func.func @transform_1(%arg0: i32) -> (i32, i32) {
    %c0_i32 = arith.constant 0 : i32
    %c0_i32_0 = arith.constant 0 : i32
    %c0_i32_1 = arith.constant 0 : i32
    return %c0_i32, %c0_i32_0 : i32, i32
  }
  func.func @transform_2(%arg0: i32) -> (i32, i32) {
    %c0_i32 = arith.constant 0 : i32
    %c0_i32_0 = arith.constant 0 : i32
    return %arg0, %c0_i32 : i32, i32
  }
}

</mosaic_0001>

<bundles_post_ra>
// kernel: tpu_custom_call.1
= control target key start
LH: loop header
LB: loop body
LE: loop exit
PB: predicated region body
PF: predicated region fallthrough
CT: control target
= control target key end

     0   :  { %7 = vsyncpa [#allocation3], 0  ;;  %s292_s0 = inlined_call_operand.hbm [shape: f32[8,16], index: 0, kind: input, shape index: {}]   ;;  %s293_s1 = inlined_call_operand.hbm [shape: f32[16,16], index: 1, kind: input, shape index: {}]   ;;  %s294_s2 = inlined_call_operand.hbm [shape: f32[8,16], index: 2, kind: output, shape index: {}]  }
   0x1   :  { %8 = vsyncpa [#allocation6], 0 }
   0x2   :  { %9 = vsyncpa [#allocation4], 0  ;;  %s226_s9 = smov [#allocation2]   ;;  %s227_s11 = smov [#allocation5]  }
   0x3   :  { %s16_s10 = sshll.u32 %s226_s9, 4  ;;  %s25_s12 = sshll.u32 %s227_s11, 4  ;;  %s17_s10 = int_to_ptr.vmem [resolvable:$true] %s16_s10  ;;  %s249_s12 = int_to_ptr.vmem [resolvable:$true] %s25_s12 }
   0x4   :  { %s154_s15 = scalar_lea.hbm %s292_s0, 128 }
   0x5   :  { %p155_p0 = scmp.ne.s32.totalorder %s292_s0, %s154_s15  ;;  %p158_p1 = scmp.lt.u32.totalorder %s154_s15, %s292_s0 }
   0x7   :  { %p160_p2 = pnand %p158_p1, %p155_p0 }
   0x9   :  { %163 = shalt.err (!%p160_p2)
}
   0xa   :  { %s164_s20 = scalar_lea.vmem %s17_s10, 128  ;;  %p169_p4 = scmp.lt.s32.totalorder %s17_s10, %s17_s10 }
   0xb   :  { %p165_p3 = scmp.ne.s32.totalorder %s17_s10, %s164_s20  ;;  %p170_p5 = scmp.lt.s32.totalorder %s164_s20, %s164_s20 }
   0xd   :  { %p171_p6 = por %p170_p5, %p169_p4 }
   0xf   :  { %p172_p7 = pnand %p171_p6, %p165_p3 }
  0x11   :  { %175 = shalt.err (!%p172_p7)
}
  0x12   :  { %19 = dma.hbm_to_vmem [thread:$0]  %s292_s0, 128, %s17_s10, [#allocation3]  }
  0x13   :  { %s176_s25 = scalar_lea.hbm %s293_s1, 256 }
  0x14   :  { %p177_p8 = scmp.ne.s32.totalorder %s293_s1, %s176_s25  ;;  %p180_p9 = scmp.lt.u32.totalorder %s176_s25, %s293_s1 }
  0x16   :  { %p182_p10 = pnand %p180_p9, %p177_p8 }
  0x18   :  { %185 = shalt.err (!%p182_p10)
}
  0x19   :  { %s186_s30 = scalar_lea.vmem %s249_s12, 256  ;;  %p191_p12 = scmp.lt.s32.totalorder %s249_s12, %s249_s12 }
  0x1a   :  { %p187_p11 = scmp.ne.s32.totalorder %s249_s12, %s186_s30  ;;  %p192_p13 = scmp.lt.s32.totalorder %s186_s30, %s186_s30 }
  0x1c   :  { %p193_p0 = por %p192_p13, %p191_p12 }
  0x1e   :  { %p194_p1 = pnand %p193_p0, %p187_p11 }
  0x20   :  { %197 = shalt.err (!%p194_p1)
}
  0x21   :  { %s228_s0 = smov 128   ;;  %s229_s3 = smov 8  }
  0x22   :  { %31 = dma.hbm_to_vmem [thread:$0]  %s293_s1, 256, %s249_s12, [#allocation6], %s228_s0, %s228_s0, %s229_s3  }
  0x23   :  { %220 = dma.done.wait [#allocation3], 128  }
  0x24   :  { %221 = vsyncadd [#allocation3], 4294967168 }
  0x25   :  { %222 = dma.done.wait [#allocation6], 256  }
  0x26   :  { %223 = vsyncadd [#allocation6], 4294967040  ;;  %v230_v0 = vmov 0.0|0.0   ;;  %vm231_vm0 = vmmov 0   ;;  %v232_v1 = vmov 0.0   ;;  %v39_v2 = vld [vmem:[#allocation5] sm:$0xff] }
  0x27   :  { %143 = vmatprep.subr.bf16.mxu0 %v230_v0  ;;  %140 = vmatprep.mubr.msk.f32.mxu0 %vm231_vm0, %v232_v1  ;;  %v40_v3 = vld [vmem:[#allocation5 + $0x8] sm:$0xff]  ;;  %v38_v5 = vld [vmem:[#allocation2] sm:$0xff]  ;;  %vm41_vm1 = vcmask 130048   ;;  %s233_s6 = smov [#allocation7]  }
  0x28   :  { %v144_v4 = vpack.c.bf16 %v40_v3, %v39_v2  ;;  %s122_s7 = sshll.u32 %s233_s6, 4  ;;  %s123_s7 = int_to_ptr.vmem [resolvable:$true] %s122_s7 }
  0x29   :  { %s198_s1 = scalar_lea.vmem %s123_s7, 128  ;;  %p203_p3 = scmp.lt.s32.totalorder %s123_s7, %s123_s7 }
  0x2a   :  { %145 = vmatpush3.bf16.msra.mxu0 %v144_v4  ;;  %p199_p2 = scmp.ne.s32.totalorder %s123_s7, %s198_s1  ;;  %p204_p4 = scmp.lt.s32.totalorder %s198_s1, %s198_s1 }
  0x2c   :  { %p205_p5 = por %p204_p4, %p203_p3 }
  0x2d   :  { %141 = vmatmul.mubr.msk.f32.vlgmr.msra.gmra.mrb[0].mxu0 %vm41_vm1, %v38_v5 }
  0x2e   :  { %p206_p6 = pnand %p205_p5, %p199_p2 }
 0x100   :  { %v111_v6 = vpop.f32.mrb[0].mxu0 }
 0x101   :  { %115 = vst.msk [vmem:[#allocation7] sm:$0xff] %vm41_vm1, %v111_v6  ;;  %v142_v7 = vpop.f32.mrb[1].mxu0 }
 0x102   :  { %209 = shalt.err (!%p206_p6)
}
 0x103   :  { %s210_s10 = scalar_lea.hbm %s294_s2, 128 }
 0x104   :  { %p211_p7 = scmp.ne.s32.totalorder %s294_s2, %s210_s10  ;;  %p214_p8 = scmp.lt.u32.totalorder %s210_s10, %s294_s2 }
 0x106   :  { %p216_p9 = pnand %p214_p8, %p211_p7 }
 0x108   :  { %219 = shalt.err (!%p216_p9)
}
 0x109   :  { %125 = dma.vmem_to_hbm [thread:$0]  %s123_s7, 128, %s294_s2, [#allocation4]  }
 0x10a   :  { %224 = dma.done.wait [#allocation4], 128  }
 0x10b   :  { %225 = vsyncadd [#allocation4], 4294967168 }
 0x10c   :  { %129 = vsyncpa [#allocation3], 1 }
 0x10d   :  { %130 = vsyncpa [#allocation6], 1 }
 0x10e   :  { %131 = vsyncpa [#allocation4], 1 }

</bundles_post_ra>
